<compile_context>
chip_gen: v5e
topology: v5e:2x2
jax: 0.10.0
libtpu: 0.0.40
codegen_flags: <defaults>
</compile_context>

<pallas_src>
import jax
import jax.numpy as jnp
from jax.experimental import pallas as pl
from jax.experimental.pallas import tpu as pltpu


def _round_up(x, m):
    return ((x + m - 1) // m) * m


def _lm_crit_kernel(inp_ref, tgt_ref, msk_ref, out_ref, gacc_ref):
    """One (row-block, vocab-block) grid step.

    inp_ref : (TN, TV) log-prob tile (any float dtype; accumulated in f32)
    tgt_ref : (TN, 1)  int32 target ids for this row block
    msk_ref : (TN, 1)  f32 mask for this row block
    out_ref : (1, 8, 128) f32 per-row-block partials:
              lane 0 = sum(-gathered*mask), lane 1 = sum(mask)
    gacc_ref: VMEM (TN, 1) f32 gathered log-prob accumulated across vocab blocks
    """
    j = pl.program_id(1)
    tile_v = inp_ref.shape[1]

    @pl.when(j == 0)
    def _():
        gacc_ref[...] = jnp.zeros_like(gacc_ref)

    logp = inp_ref[...].astype(jnp.float32)          # (TN, TV)
    tgt = tgt_ref[...]                               # (TN, 1) int32
    # Absolute vocab ids for this vocab block; padded / out-of-range lanes
    # never match a valid target, so jnp.where drops them (no NaN propagation).
    vocab_ids = jax.lax.broadcasted_iota(jnp.int32, logp.shape, 1) + j * tile_v
    gacc_ref[...] += jnp.sum(
        jnp.where(vocab_ids == tgt, logp, 0.0), axis=1, keepdims=True)

    @pl.when(j == pl.num_programs(1) - 1)
    def _():
        msk = msk_ref[...]                           # (TN, 1) f32
        partial_loss = jnp.sum(-gacc_ref[...] * msk)
        partial_mask = jnp.sum(msk)
        lane_ids = jax.lax.broadcasted_iota(jnp.int32, out_ref.shape, 2)
        out_ref[...] = jnp.where(
            lane_ids == 0, partial_loss,
            jnp.where(lane_ids == 1, partial_mask, 0.0))


def language_model_criterion(inp, target, mask, *, vmem_budget_bytes=24 * 1024 * 1024):
    """JAX/Pallas equivalent of LanguageModelCriterion.forward.

    inp:    (B, T, V) float (f32 or bf16) log-prob scores
    target: (B, T_tgt) int  with T_tgt >= T
    mask:   (B, T_tgt) float with T_tgt >= T
    returns scalar float32 loss.
    """
    B, T, V = inp.shape
    target = target[:, :T].astype(jnp.int32)
    mask = mask[:, :T].astype(jnp.float32)

    N = B * T
    inp_flat = inp.reshape(N, V)
    tgt_flat = target.reshape(N, 1)
    msk_flat = mask.reshape(N, 1)

    # --- tile sizing: biggest row block whose double-buffered input tile fits
    #     a v7x-safe VMEM budget; vocab axis blocked for large vocabularies. ---
    itemsize = jnp.dtype(inp.dtype).itemsize
    tile_v = V if V <= 2048 else 2048                    # full dim or multiple of 128
    rows_by_budget = vmem_budget_bytes // (2 * itemsize * tile_v)  # 2x: double buffer
    tile_n = max(8, min(1024, (rows_by_budget // 8) * 8, _round_up(N, 8)))

    # Pad rows so N is a multiple of tile_n (padded rows carry mask == 0).
    n_pad = _round_up(N, tile_n)
    if n_pad != N:
        pad = n_pad - N
        inp_flat = jnp.pad(inp_flat, ((0, pad), (0, 0)))
        tgt_flat = jnp.pad(tgt_flat, ((0, pad), (0, 0)))
        msk_flat = jnp.pad(msk_flat, ((0, pad), (0, 0)))

    g_rows = n_pad // tile_n
    g_vocab = pl.cdiv(V, tile_v)

    partials = pl.pallas_call(
        _lm_crit_kernel,
        out_shape=jax.ShapeDtypeStruct((g_rows, 8, 128), jnp.float32),
        grid_spec=pltpu.PrefetchScalarGridSpec(
            num_scalar_prefetch=0,
            grid=(g_rows, g_vocab),
            in_specs=[
                pl.BlockSpec((tile_n, tile_v), lambda i, j: (i, j)),
                pl.BlockSpec((tile_n, 1), lambda i, j: (i, 0)),
                pl.BlockSpec((tile_n, 1), lambda i, j: (i, 0)),
            ],
            out_specs=pl.BlockSpec((1, 8, 128), lambda i, j: (i, 0, 0)),
            scratch_shapes=[pltpu.VMEM((tile_n, 1), jnp.float32)],
        ),
        compiler_params=pltpu.CompilerParams(
            dimension_semantics=("parallel", "arbitrary"),
            vmem_limit_bytes=48 * 1024 * 1024,
        ),
    )(inp_flat, tgt_flat, msk_flat)

    # Tiny cross-block reduce + normalization in JAX.
    loss_sum = jnp.sum(partials[:, 0, 0])
    mask_sum = jnp.sum(partials[:, 0, 1])
    return loss_sum / mask_sum   # NaN if sum(mask)==0, matching PyTorch behavior


if __name__ == "__main__":
    key = jax.random.PRNGKey(0)

    def run_case(case_key, B, T, V, T_tgt):
        k1, k2, k3 = jax.random.split(case_key, 3)
        inp = jax.nn.log_softmax(
            jax.random.normal(k1, (B, T, V), dtype=jnp.float32), axis=-1)
        target = jax.random.randint(k2, (B, T_tgt), 0, V, dtype=jnp.int32)
        mask = (jax.random.uniform(k3, (B, T_tgt)) > 0.3).astype(jnp.float32)
        mask = mask.at[0, 0].set(1.0)  # avoid all-zero mask (NaN, same as PyTorch)

        loss = jax.block_until_ready(language_model_criterion(inp, target, mask))

        # Pure-JAX reference.
        tgt_s, msk_s = target[:, :T], mask[:, :T]
        gathered = jnp.take_along_axis(inp, tgt_s[..., None], axis=-1)[..., 0]
        ref = jnp.sum(-gathered * msk_s) / jnp.sum(msk_s)
        assert jnp.allclose(loss, ref, rtol=1e-5, atol=1e-5), (B, T, V, loss, ref)

    keys = jax.random.split(key, 3)
    run_case(keys[0], B=2, T=8, V=32, T_tgt=10)    # small base case
    run_case(keys[1], B=3, T=5, V=200, T_tgt=7)    # row padding (N=15 -> 16)
    run_case(keys[2], B=2, T=8, V=4100, T_tgt=9)   # vocab-blocked path (tile_v=2048)

    print("KERNEL_OK")
</pallas_src>

<mosaic_0001>
module attributes {stable_mosaic.version = 11 : i64} {
  func.func @_lm_crit_kernel(%arg0: i32, %arg1: i32, %arg2: memref<16x32xf32, #tpu.memory_space<vmem>>, %arg3: memref<16x1xi32, #tpu.memory_space<vmem>>, %arg4: memref<16x1xf32, #tpu.memory_space<vmem>>, %arg5: memref<1x8x128xf32, #tpu.memory_space<vmem>>, %arg6: memref<16x1xf32, #tpu.memory_space<vmem>>) attributes {dimension_semantics = [#tpu.dimension_semantics<parallel>, #tpu.dimension_semantics<arbitrary>], iteration_bounds = array<i64: 1, 1>, scalar_prefetch = 0 : i64, scratch_operands = 1 : i64, tpu.core_type = #tpu.core_type<tc>, window_params = [{transform_indices = @transform_0, window_bounds = array<i64: 16, 32>}, {transform_indices = @transform_1, window_bounds = array<i64: 16, 1>}, {transform_indices = @transform_2, window_bounds = array<i64: 16, 1>}, {transform_indices = @transform_3, window_bounds = array<i64: 1, 8, 128>}]} {
    %c0_i32 = arith.constant 0 : i32
    %0 = arith.cmpi eq, %arg1, %c0_i32 : i32
    %1 = arith.extui %0 : i1 to i32
    %c0_i32_0 = arith.constant 0 : i32
    %2 = arith.cmpi ne, %1, %c0_i32_0 : i32
    scf.if %2 {
      %cst_11 = arith.constant 0.000000e+00 : f32
      %21 = vector.broadcast %cst_11 : f32 to vector<16x1xf32>
      %c0_12 = arith.constant 0 : index
      %c0_13 = arith.constant 0 : index
      %22 = vector.load %arg6[%c0_12, %c0_13] : memref<16x1xf32, #tpu.memory_space<vmem>>, vector<16x1xf32>
      tpu.vector_store %arg6[%c0_12, %c0_13], %21 {strides = array<i32>} : memref<16x1xf32, #tpu.memory_space<vmem>>, vector<16x1xf32>,
    } else {
    }
    %c0 = arith.constant 0 : index
    %c0_1 = arith.constant 0 : index
    %3 = vector.load %arg2[%c0, %c0_1] : memref<16x32xf32, #tpu.memory_space<vmem>>, vector<16x32xf32>
    %c0_2 = arith.constant 0 : index
    %c0_3 = arith.constant 0 : index
    %4 = vector.load %arg3[%c0_2, %c0_3] : memref<16x1xi32, #tpu.memory_space<vmem>>, vector<16x1xi32>
    %5 = tpu.iota {dimensions = array<i32: 1>} : vector<16x32xi32>
    %c32_i32 = arith.constant 32 : i32
    %6 = arith.muli %arg1, %c32_i32 : i32
    %7 = vector.broadcast %6 : i32 to vector<16x32xi32>
    %8 = arith.addi %5, %7 : vector<16x32xi32>
    %c0_4 = arith.constant 0 : index
    %c0_5 = arith.constant 0 : index
    %9 = vector.load %arg6[%c0_4, %c0_5] : memref<16x1xf32, #tpu.memory_space<vmem>>, vector<16x1xf32>
    %10 = vector.broadcast %4 : vector<16x1xi32> to vector<16x32xi32>
    %11 = arith.cmpi eq, %8, %10 : vector<16x32xi32>
    %cst = arith.constant 0.000000e+00 : f32
    %12 = vector.broadcast %cst : f32 to vector<16x32xf32>
    %13 = arith.select %11, %3, %12 : vector<16x32xi1>, vector<16x32xf32>
    %cst_6 = arith.constant dense<0.000000e+00> : vector<16xf32>
    %14 = vector.multi_reduction <add>, %13, %cst_6 [1] : vector<16x32xf32> to vector<16xf32>
    %15 = vector.shape_cast %14 : vector<16xf32> to vector<16x1xf32>
    %16 = arith.addf %9, %15 : vector<16x1xf32>
    %c0_7 = arith.constant 0 : index
    %c0_8 = arith.constant 0 : index
    %17 = vector.load %arg6[%c0_7, %c0_8] : memref<16x1xf32, #tpu.memory_space<vmem>>, vector<16x1xf32>
    tpu.vector_store %arg6[%c0_7, %c0_8], %16 {strides = array<i32>} : memref<16x1xf32, #tpu.memory_space<vmem>>, vector<16x1xf32>,
    %c0_i32_9 = arith.constant 0 : i32
    %18 = arith.cmpi eq, %arg1, %c0_i32_9 : i32
    %19 = arith.extui %18 : i1 to i32
    %c0_i32_10 = arith.constant 0 : i32
    %20 = arith.cmpi ne, %19, %c0_i32_10 : i32
    scf.if %20 {
      %c0_11 = arith.constant 0 : index
      %c0_12 = arith.constant 0 : index
      %21 = vector.load %arg4[%c0_11, %c0_12] : memref<16x1xf32, #tpu.memory_space<vmem>>, vector<16x1xf32>
      %c0_13 = arith.constant 0 : index
      %c0_14 = arith.constant 0 : index
      %22 = vector.load %arg6[%c0_13, %c0_14] : memref<16x1xf32, #tpu.memory_space<vmem>>, vector<16x1xf32>
      %cst_15 = arith.constant 0.000000e+00 : f32
      %23 = vector.broadcast %cst_15 : f32 to vector<16x1xf32>
      %24 = arith.subf %23, %22 : vector<16x1xf32>
      %25 = arith.mulf %24, %21 : vector<16x1xf32>
      %26 = vector.shape_cast %25 : vector<16x1xf32> to vector<1x16x1xf32>
      %cst_16 = arith.constant dense<0.000000e+00> : vector<1xf32>
      %27 = vector.multi_reduction <add>, %26, %cst_16 [1, 2] : vector<1x16x1xf32> to vector<1xf32>
      %28 = vector.shape_cast %27 : vector<1xf32> to vector<1x1x1xf32>
      %29 = vector.extract %28[0, 0, 0] : f32 from vector<1x1x1xf32>
      %30 = vector.shape_cast %21 : vector<16x1xf32> to vector<1x16x1xf32>
      %cst_17 = arith.constant dense<0.000000e+00> : vector<1xf32>
      %31 = vector.multi_reduction <add>, %30, %cst_17 [1, 2] : vector<1x16x1xf32> to vector<1xf32>
      %32 = vector.shape_cast %31 : vector<1xf32> to vector<1x1x1xf32>
      %33 = vector.extract %32[0, 0, 0] : f32 from vector<1x1x1xf32>
      %34 = tpu.iota {dimensions = array<i32: 2>} : vector<1x8x128xi32>
      %c0_i32_18 = arith.constant 0 : i32
      %35 = vector.broadcast %c0_i32_18 : i32 to vector<1x8x128xi32>
      %36 = arith.cmpi eq, %34, %35 : vector<1x8x128xi32>
      %c1_i32 = arith.constant 1 : i32
      %37 = vector.broadcast %c1_i32 : i32 to vector<1x8x128xi32>
      %38 = arith.cmpi eq, %34, %37 : vector<1x8x128xi32>
      %cst_19 = arith.constant 0.000000e+00 : f32
      %39 = vector.broadcast %33 : f32 to vector<1x8x128xf32>
      %40 = vector.broadcast %cst_19 : f32 to vector<1x8x128xf32>
      %41 = arith.select %38, %39, %40 : vector<1x8x128xi1>, vector<1x8x128xf32>
      %42 = vector.broadcast %29 : f32 to vector<1x8x128xf32>
      %43 = arith.select %36, %42, %41 : vector<1x8x128xi1>, vector<1x8x128xf32>
      %c0_20 = arith.constant 0 : index
      %c0_21 = arith.constant 0 : index
      %c0_22 = arith.constant 0 : index
      %44 = vector.load %arg5[%c0_20, %c0_21, %c0_22] : memref<1x8x128xf32, #tpu.memory_space<vmem>>, vector<1x8x128xf32>
      tpu.vector_store %arg5[%c0_20, %c0_21, %c0_22], %43 {strides = array<i32>} : memref<1x8x128xf32, #tpu.memory_space<vmem>>, vector<1x8x128xf32>,
    } else {
    }
    return
  }
  func.func @transform_0(%arg0: i32, %arg1: i32) -> (i32, i32) {
    %c0_i32 = arith.constant 0 : i32
    return %arg0, %arg1 : i32, i32
  }
  func.func @transform_1(%arg0: i32, %arg1: i32) -> (i32, i32) {
    %c0_i32 = arith.constant 0 : i32
    %c0_i32_0 = arith.constant 0 : i32
    return %arg0, %c0_i32 : i32, i32
  }
  func.func @transform_2(%arg0: i32, %arg1: i32) -> (i32, i32) {
    %c0_i32 = arith.constant 0 : i32
    %c0_i32_0 = arith.constant 0 : i32
    return %arg0, %c0_i32 : i32, i32
  }
  func.func @transform_3(%arg0: i32, %arg1: i32) -> (i32, i32, i32) {
    %c0_i32 = arith.constant 0 : i32
    %c0_i32_0 = arith.constant 0 : i32
    %c0_i32_1 = arith.constant 0 : i32
    return %arg0, %c0_i32, %c0_i32_0 : i32, i32, i32
  }
}

</mosaic_0001>

<bundles_post_ra>
// kernel: tpu_custom_call.1
= control target key start
LH: loop header
LB: loop body
LE: loop exit
PB: predicated region body
PF: predicated region fallthrough
CT: control target
= control target key end

     0   :  { %s205_s0 = inlined_call_operand.vmem [shape: f32[16,32], index: 0, kind: input, shape index: {}]   ;;  %s206_s1 = inlined_call_operand.vmem [shape: s32[16,1], index: 1, kind: input, shape index: {}]   ;;  %s207_s2 = inlined_call_operand.vmem [shape: f32[16,1], index: 2, kind: input, shape index: {}]   ;;  %s208_s3 = inlined_call_operand.hbm [shape: f32[1,8,128], index: 3, kind: output, shape index: {}]  }
   0x1   :  { %v24_v0 = vld [vmem:[%s206_s1] sm:$0xff] }
   0x2   :  { %8 = vsyncpa [#allocation4], 0  ;;  %v147_v1 = vmov 0   ;;  %v25_v2 = vld [vmem:[%s206_s1 + $0x8] sm:$0xff]  ;;  %v26_v3 = vlaneseq  ;;  %v22_v5 = vld [vmem:[%s205_s0] sm:$0xff]  ;;  %vm43_vm0 = vcmask 261120  }
   0x3   :  { %120 = vset.pattern.permute.xlu0 %v147_v1  ;;  %v23_v9 = vld [vmem:[%s205_s0 + $0x8] sm:$0xff]  ;;  %vm19_vm3 = vcmask 7168   ;;  %v148_v13 = vmov 0.0   ;;  %v58_v22 = vld [vmem:[%s207_s2] sm:$0xff]  ;;  %s104_s26 = sshll.u32 %s208_s3, 4  ;;  %s105_s26 = int_to_ptr.hbm [resolvable:$true] %s104_s26 }
   0x4   :  { %34 = vperm.xlu0 %120, %v24_v0   ;;  %v176_v4 = vand.u32 127, %v26_v3  ;;  %20 = vst.msk [vmem:[#allocation2] sm:$0xff] %vm19_vm3, %v148_v13  ;;  %v59_v23 = vld [vmem:[%s207_s2 + $0x8] sm:$0xff]  ;;  %v78_v31 = vsel %vm19_vm3, %v58_v22, 0.0  ;;  %s149_s2 = smov [#allocation3]  }
   0x5   :  { %21 = vst.msk [vmem:[#allocation2 + $0x8] sm:$0xff] %vm19_vm3, %v148_v13  ;;  %v79_v32 = vsel %vm19_vm3, %v59_v23, 0.0  ;;  %s102_s22 = sshll.u32 %s149_s2, 4  ;;  %s103_s22 = int_to_ptr.vmem [resolvable:$true] %s102_s22 }
   0x6   :  { %v80_v33 = vadd.f32 %v79_v32, %v78_v31  ;;  %vm91_vm4 = vcmp.eq.s32.totalorder %v176_v4, 1  ;;  %vm90_vm5 = vcmp.eq.s32.totalorder %v176_v4, 0 }
   0xb   :  { %v31_v14 = vld [vmem:[#allocation2] sm:$0xff] }
   0xc   :  { %37 = vperm.xlu0 %120, %v25_v2   ;;  %v32_v17 = vld [vmem:[#allocation2 + $0x8] sm:$0xff] }
  0x76   :  { %v35_v6 = vpop.permute.xlu0 %34 }
  0x77   :  { %vm39_vm1 = vcmp.eq.s32.totalorder %v176_v4, %v35_v6 }
  0x78   :  { %v41_v7 = vsel %vm39_vm1, %v22_v5, 0.0 }
  0x79   :  { %v44_v8 = vsel %vm43_vm0, %v41_v7, 0.0 }
  0x7a   :  { %45 = vadd.xlane.f32.xlu1 %v44_v8 }
  0x7e   :  { %v38_v10 = vpop.permute.xlu0 %37 }
  0x7f   :  { %vm40_vm2 = vcmp.eq.s32.totalorder %v176_v4, %v38_v10 }
  0x80   :  { %v42_v11 = vsel %vm40_vm2, %v23_v9, 0.0 }
  0x81   :  { %v47_v12 = vsel %vm43_vm0, %v42_v11, 0.0 }
  0x82   :  { %48 = vadd.xlane.f32.xlu1 %v47_v12 }
  0xed   :  { %v46_v15 = vpop.xlane.xlu1 %45 }
  0xee   :  { %v50_v16 = vadd.f32 %v46_v15, %v31_v14 }
  0xf0   :  { %53 = vst.msk [vmem:[#allocation2] sm:$0xff] %vm19_vm3, %v50_v16 }
  0xf5   :  { %v49_v18 = vpop.xlane.xlu1 %48 }
  0xf6   :  { %v51_v19 = vadd.f32 %v49_v18, %v32_v17 }
  0xf7   :  { %v60_v20 = vld [vmem:[#allocation2] sm:$0xff] }
  0xf8   :  { %54 = vst.msk [vmem:[#allocation2 + $0x8] sm:$0xff] %vm19_vm3, %v51_v19  ;;  %v62_v21 = vsub.f32 0.0, %v60_v20 }
  0xfa   :  { %v64_v26 = vmul.f32 %v62_v21, %v58_v22 }
  0xfc   :  { %v66_v28 = vsel %vm19_vm3, %v64_v26, 0.0 }
  0xff   :  { %v61_v24 = vld [vmem:[#allocation2 + $0x8] sm:$0xff] }
 0x100   :  { %v63_v25 = vsub.f32 0.0, %v61_v24 }
 0x102   :  { %v65_v27 = vmul.f32 %v63_v25, %v59_v23 }
 0x104   :  { %v67_v29 = vsel %vm19_vm3, %v65_v27, 0.0 }
 0x105   :  { %v68_v30 = vadd.f32 %v67_v29, %v66_v28 }
 0x107   :  { %69 = vadd.xlane.f32.xlu2 %v68_v30 }
 0x10f   :  { %81 = vadd.xlane.f32.xlu2 %v80_v33 }
 0x17a   :  { %v70_v34 = vpop.xlane.xlu2 %69 }
 0x17b   :  { %v71_v35 = vrot.slane %v70_v34, 4 }
 0x17d   :  { %v72_v36 = vadd.f32 %v71_v35, %v70_v34 }
 0x17f   :  { %v73_v37 = vrot.slane %v72_v36, 2 }
 0x181   :  { %v74_v38 = vadd.f32 %v73_v37, %v72_v36 }
 0x182   :  { %v82_v39 = vpop.xlane.xlu2 %81 }
 0x183   :  { %v83_v40 = vrot.slane %v82_v39, 4  ;;  %v75_v41 = vrot.slane %v74_v38, 1 }
 0x185   :  { %v84_v42 = vadd.f32 %v83_v40, %v82_v39  ;;  %v76_v43 = vadd.f32 %v75_v41, %v74_v38 }
 0x187   :  { %v85_v44 = vrot.slane %v84_v42, 2  ;;  %113 = vpush %v76_v43 }
 0x189   :  { %v86_v45 = vadd.f32 %v85_v44, %v84_v42 }
 0x18b   :  { %v87_v46 = vrot.slane %v86_v45, 1 }
 0x18d   :  { %v88_v47 = vadd.f32 %v87_v46, %v86_v45 }
 0x18f   :  { %115 = vpush %v88_v47 }
 0x1b8   :  { %s114_s23 = spop %113 }
 0x1b9   :  { %v94_v49 = vstv %s114_s23 }
 0x1c0   :  { %s116_s27 = spop %115 }
 0x1c1   :  { %v92_v48 = vstv %s116_s27 }
 0x1c2   :  { %v93_v50 = vsel %vm91_vm4, %v92_v48, 0.0 }
 0x1c3   :  { %v95_v51 = vsel %vm90_vm5, %v94_v49, %v93_v50 }
 0x1c4   :  { %96 = vst [vmem:[#allocation3] sm:$0xff] %v95_v51 }
 0x1c5   :  { %107 = dma.vmem_to_hbm [thread:$0]  %s103_s22, 128, %s105_s26, [#allocation4]  }
 0x1c6   :  { %145 = dma.done.wait [#allocation4], 128  }
 0x1c7   :  { %146 = vsyncadd [#allocation4], 4294967168 }
 0x1c8   :  { %112 = vsyncpa [#allocation4], 1 }

</bundles_post_ra>
